<compile_context>
chip_gen: v6e
topology: v6e:2x2x1
jax: 0.10.0
libtpu: 0.0.40
codegen_flags: <defaults>
</compile_context>

<pallas_src>
import functools

import jax
import jax.numpy as jnp
from jax.experimental import pallas as pl
from jax.experimental.pallas import tpu as pltpu


def _round_up(x, m):
    return ((x + m - 1) // m) * m


def _pad_target(dim):
    """Lane-aligned padded size for a matmul dim.

    Already-128-aligned dims are left untouched (padding them would add a
    full extra HBM pass over log_S / X_, which dominates this memory-bound
    op).  Unaligned dims are padded to a 128 multiple; tiny dims go to 256 so
    a v6e/v7x 256x256 MXU tile is fully utilized (padding cost is negligible
    for small dims).
    """
    if dim % 128 == 0:
        return dim
    return max(_round_up(dim, 128), 256)


def _default_vmem_limit():
    """Generation-aware VMEM request: ~75% of physical, capped at 110 MiB.

    v7x (64 MiB physical) -> ~48 MiB, v5e/v6e (128 MiB) -> ~96 MiB.  Falls
    back to a conservative 48 MiB if the hardware query is unavailable.
    """
    try:
        info = pltpu.get_tpu_info()
        cap = int(getattr(info, "vmem_capacity_bytes", 0)) or 64 * 1024 * 1024
    except Exception:
        cap = 64 * 1024 * 1024
    return min(int(cap * 0.75), 110 * 1024 * 1024)


# --------------------------------------------------------------------------
# Kernels
# --------------------------------------------------------------------------
def _fused_kernel(log_s_ref, d_ref, *rest, relu_activation, use_bias, dot_dtype):
    """Activation + full-K matmul, one sample tile per grid step."""
    if use_bias:
        bias_ref, s_ref, x_ref = rest
    else:
        s_ref, x_ref = rest

    log_s = log_s_ref[...]
    s = jnp.maximum(log_s, 0.0) if relu_activation else jnp.exp(log_s)
    s_ref[...] = s.astype(s_ref.dtype)

    lhs = s.astype(dot_dtype) if dot_dtype is not None else s
    # D was pre-transposed to (K, M): natural MXU orientation.
    x = jnp.dot(lhs, d_ref[...], preferred_element_type=jnp.float32)
    if use_bias:
        x = x + bias_ref[...]
    x_ref[...] = x.astype(x_ref.dtype)


def _kblocked_kernel(log_s_ref, d_ref, *rest, relu_activation, use_bias,
                     dot_dtype):
    """Activation + K-blocked matmul with a VMEM f32 accumulator."""
    if use_bias:
        bias_ref, s_ref, x_ref, acc_ref = rest
    else:
        s_ref, x_ref, acc_ref = rest

    k = pl.program_id(1)

    log_s = log_s_ref[...]
    s = jnp.maximum(log_s, 0.0) if relu_activation else jnp.exp(log_s)
    s_ref[...] = s.astype(s_ref.dtype)

    @pl.when(k == 0)
    def _():
        acc_ref[...] = jnp.zeros_like(acc_ref)

    lhs = s.astype(dot_dtype) if dot_dtype is not None else s
    acc_ref[...] += jnp.dot(lhs, d_ref[...], preferred_element_type=jnp.float32)

    @pl.when(k == pl.num_programs(1) - 1)
    def _():
        x = acc_ref[...]
        if use_bias:
            x = x + bias_ref[...]
        x_ref[...] = x.astype(x_ref.dtype)


# --------------------------------------------------------------------------
# Wrapper
# --------------------------------------------------------------------------
def sparse_coding_forward(log_s, D, bias=None, *, relu_activation=False,
                          learn_D=True, norm_D=True, tile_n=1024, tile_k=None,
                          dot_dtype=None, vmem_limit_bytes=None,
                          force_k_blocked=False):
    """Pallas forward. log_s: (N, K), D: (M, K), bias: (M,) or None.

    Returns (S, X_) matching the PyTorch module's forward.
    """
    N, K = log_s.shape
    M, K2 = D.shape
    assert K == K2, "D must be (M, K) with K matching log_S's second dim"

    use_bias = bias is not None
    dtype = log_s.dtype
    if vmem_limit_bytes is None:
        vmem_limit_bytes = _default_vmem_limit()

    # Column-wise normalization over the feature axis (axis 0 of the module's
    # (M, K) D) — identical to torch.linalg.norm(self.D, dim=0, keepdim=True).
    # D never changes across grid steps, so do it exactly once here.
    if learn_D and norm_D:
        D = D / jnp.linalg.norm(D, axis=0, keepdims=True)

    K_pad = _pad_target(K)
    M_pad = _pad_target(M)

    d_dtype = dot_dtype if dot_dtype is not None else dtype
    # Pre-transpose D to (K, M) once (plus optional bf16 cast), then pad.
    D_t = D.astype(d_dtype).T
    if K_pad != K or M_pad != M:
        D_t = jnp.pad(D_t, ((0, K_pad - K), (0, M_pad - M)))

    # Only pad log_S when K needs alignment (an extra jnp.pad is a full HBM
    # pass over an N x K array — the dominant cost for this memory-bound op).
    log_s_in = log_s if K_pad == K else jnp.pad(log_s, ((0, 0), (0, K_pad - K)))

    if use_bias:
        bias_in = bias.astype(dtype).reshape(1, M)
        if M_pad != M:
            bias_in = jnp.pad(bias_in, ((0, 0), (0, M_pad - M)))

    itemsize = jnp.dtype(dtype).itemsize
    d_item = jnp.dtype(d_dtype).itemsize
    d_bytes = K_pad * M_pad * d_item
    bias_bytes = M_pad * itemsize if use_bias else 0

    # VMEM budget: 75% of the requested limit minus ~2 MiB compiler headroom.
    budget = max(int(vmem_limit_bytes * 0.75) - 2 * 1024 * 1024,
                 4 * 1024 * 1024)

    use_blocked = force_k_blocked or (d_bytes > budget // 2)

    kernel_args = dict(relu_activation=relu_activation, use_bias=use_bias,
                       dot_dtype=dot_dtype)

    if not use_blocked:
        # ---- full-K path: D resident (single-buffered), tile over samples.
        per_row = itemsize * (4 * K_pad + 3 * M_pad)   # logS/S x2, X_ x2, f32 temp
        avail = max(budget - d_bytes - bias_bytes, per_row * 8)
        tile = min(tile_n, _round_up(N, 8), max((avail // per_row) // 8 * 8, 8))
        tile = max(tile, 8)
        # Ensure >= 2 grid steps (megacore sharding on v7x + pipeline overlap).
        while N > 8 and pl.cdiv(N, tile) < 2 and tile > 8:
            tile = max(8, _round_up(tile // 2, 8))

        grid = (pl.cdiv(N, tile),)
        in_specs = [
            pl.BlockSpec((tile, K_pad), lambda i: (i, 0)),
            pl.BlockSpec((K_pad, M_pad), lambda i: (0, 0),
                         pipeline_mode=pl.Buffered(1)),
        ]
        inputs = [log_s_in, D_t]
        if use_bias:
            in_specs.append(pl.BlockSpec((1, M_pad), lambda i: (0, 0),
                                         pipeline_mode=pl.Buffered(1)))
            inputs.append(bias_in)
        out_specs = (
            pl.BlockSpec((tile, K_pad), lambda i: (i, 0)),
            pl.BlockSpec((tile, M_pad), lambda i: (i, 0)),
        )
        scratch_shapes = []
        dims = ("parallel",)
        kernel = functools.partial(_fused_kernel, **kernel_args)
    else:
        # ---- K-blocked path: only a (tile_k, M) slice of D resident,
        # accumulate X_ in an f32 VMEM scratch across the K axis.
        tk = 512 if tile_k is None else tile_k
        tk = min(tk, K_pad)
        tk = max(128, (tk // 128) * 128)
        while K_pad % tk:
            tk -= 128
        # TODO(synk): for very large M, also tile the M axis (parallel) so the
        # (tile_n, M) accumulator and (tile_k, M) D slice fit VMEM.
        per_row = itemsize * (4 * tk + 3 * M_pad)
        d_blk_bytes = 2 * tk * M_pad * d_item
        avail = max(budget - d_blk_bytes - bias_bytes, per_row * 8)
        tile = min(tile_n, _round_up(N, 8), max((avail // per_row) // 8 * 8, 8))
        tile = max(tile, 8)
        while N > 8 and pl.cdiv(N, tile) < 2 and tile > 8:
            tile = max(8, _round_up(tile // 2, 8))

        grid = (pl.cdiv(N, tile), K_pad // tk)
        in_specs = [
            pl.BlockSpec((tile, tk), lambda i, k: (i, k)),
            pl.BlockSpec((tk, M_pad), lambda i, k: (k, 0)),
        ]
        inputs = [log_s_in, D_t]
        if use_bias:
            in_specs.append(pl.BlockSpec((1, M_pad), lambda i, k: (0, 0),
                                         pipeline_mode=pl.Buffered(1)))
            inputs.append(bias_in)
        out_specs = (
            pl.BlockSpec((tile, tk), lambda i, k: (i, k)),
            pl.BlockSpec((tile, M_pad), lambda i, k: (i, 0)),
        )
        scratch_shapes = [pltpu.VMEM((tile, M_pad), jnp.float32)]
        dims = ("parallel", "arbitrary")
        kernel = functools.partial(_kblocked_kernel, **kernel_args)

    flops = 2 * N * K_pad * M_pad
    transcendentals = 0 if relu_activation else N * K_pad
    bytes_accessed = int(itemsize * (2 * N * K_pad + N * M_pad)
                         + d_item * K_pad * M_pad
                         + (itemsize * M_pad if use_bias else 0))

    S_p, X_p = pl.pallas_call(
        kernel,
        out_shape=(jax.ShapeDtypeStruct((N, K_pad), dtype),
                   jax.ShapeDtypeStruct((N, M_pad), dtype)),
        grid_spec=pltpu.PrefetchScalarGridSpec(
            num_scalar_prefetch=0,
            grid=grid,
            in_specs=in_specs,
            out_specs=out_specs,
            scratch_shapes=scratch_shapes),
        compiler_params=pltpu.CompilerParams(
            dimension_semantics=dims,
            vmem_limit_bytes=int(vmem_limit_bytes)),
        cost_estimate=pl.CostEstimate(flops=flops,
                                      transcendentals=transcendentals,
                                      bytes_accessed=bytes_accessed),
    )(*inputs)

    # Slice only when padding was actually applied (a slice is a full extra
    # HBM pass for a memory-bound op).
    S = S_p if K_pad == K else S_p[:, :K]
    X_ = X_p if M_pad == M else X_p[:, :M]
    return S, X_


# --------------------------------------------------------------------------
# Pure-JAX reference
# --------------------------------------------------------------------------
def _ref_forward(log_s, D, bias, relu_activation, learn_D, norm_D):
    Dn = D
    if learn_D and norm_D:
        Dn = D / jnp.linalg.norm(D, axis=0, keepdims=True)
    S = jnp.maximum(log_s, 0.0) if relu_activation else jnp.exp(log_s)
    X_ = S @ Dn.T
    if bias is not None:
        X_ = X_ + bias
    return S, X_


if __name__ == "__main__":
    key = jax.random.PRNGKey(0)
    k_d, k_s, k_b, k_d2, k_s2 = jax.random.split(key, 5)

    # ---- Test 1: exp activation + bias (module defaults with initial_S).
    N, M, K = 16, 64, 32
    D = jax.random.normal(k_d, (M, K), dtype=jnp.float32)
    initial_S = jax.random.uniform(k_s, (N, K), dtype=jnp.float32,
                                   minval=0.05, maxval=1.0)
    log_S = jnp.log(initial_S + 1e-10)
    bias = jnp.zeros((M,), dtype=jnp.float32)   # module init: zeros(M)

    S, X_ = sparse_coding_forward(log_S, D, bias, relu_activation=False,
                                  learn_D=True, norm_D=True)
    jax.block_until_ready((S, X_))
    S_ref, X_ref = _ref_forward(log_S, D, bias, False, True, True)
    assert S.shape == (N, K) and X_.shape == (N, M)
    assert jnp.allclose(S, S_ref, atol=1e-5, rtol=1e-5)
    assert jnp.allclose(X_, X_ref, atol=1e-4, rtol=1e-4)

    # ---- Test 2: relu activation, no bias, ragged N (exercises cdiv grid).
    N2 = 20
    log_S2 = jax.random.normal(k_s2, (N2, K), dtype=jnp.float32)
    S2, X2 = sparse_coding_forward(log_S2, D, None, relu_activation=True,
                                   learn_D=True, norm_D=True)
    jax.block_until_ready((S2, X2))
    S2_ref, X2_ref = _ref_forward(log_S2, D, None, True, True, True)
    assert S2.shape == (N2, K) and X2.shape == (N2, M)
    assert jnp.allclose(S2, S2_ref, atol=1e-5, rtol=1e-5)
    assert jnp.allclose(X2, X2_ref, atol=1e-4, rtol=1e-4)

    # ---- Test 3: forced K-blocked accumulator path (large-dictionary path).
    K3 = 256
    D3 = jax.random.normal(k_d2, (M, K3), dtype=jnp.float32)
    initial_S3 = jax.random.uniform(k_s, (N, K3), dtype=jnp.float32,
                                    minval=0.05, maxval=1.0)
    log_S3 = jnp.log(initial_S3 + 1e-10)
    bias3 = 0.1 * jax.random.normal(k_b, (M,), dtype=jnp.float32)
    S3, X3 = sparse_coding_forward(log_S3, D3, bias3, relu_activation=False,
                                   learn_D=True, norm_D=True,
                                   force_k_blocked=True, tile_k=128)
    jax.block_until_ready((S3, X3))
    S3_ref, X3_ref = _ref_forward(log_S3, D3, bias3, False, True, True)
    assert S3.shape == (N, K3) and X3.shape == (N, M)
    assert jnp.allclose(S3, S3_ref, atol=1e-5, rtol=1e-5)
    assert jnp.allclose(X3, X3_ref, atol=1e-4, rtol=1e-4)

    print("KERNEL_OK")
</pallas_src>

<mosaic_0001>
module attributes {stable_mosaic.version = 11 : i64} {
  func.func @_fused_kernel(%arg0: i32, %arg1: memref<8x256xf32, #tpu.memory_space<vmem>>, %arg2: memref<256x256xf32, #tpu.memory_space<vmem>>, %arg3: memref<1x256xf32, #tpu.memory_space<vmem>>, %arg4: memref<8x256xf32, #tpu.memory_space<vmem>>, %arg5: memref<8x256xf32, #tpu.memory_space<vmem>>) attributes {dimension_semantics = [#tpu.dimension_semantics<parallel>], iteration_bounds = array<i64: 2>, scalar_prefetch = 0 : i64, scratch_operands = 0 : i64, tpu.core_type = #tpu.core_type<tc>, window_params = [{transform_indices = @transform_0, window_bounds = array<i64: 8, 256>}, {pipeline_mode = #tpu.pipeline_mode<synchronous>, transform_indices = @transform_1, window_bounds = array<i64: 256, 256>}, {pipeline_mode = #tpu.pipeline_mode<synchronous>, transform_indices = @transform_2, window_bounds = array<i64: 1, 256>}, {transform_indices = @transform_3, window_bounds = array<i64: 8, 256>}, {transform_indices = @transform_4, window_bounds = array<i64: 8, 256>}]} {
    %c0 = arith.constant 0 : index
    %c0_0 = arith.constant 0 : index
    %0 = vector.load %arg1[%c0, %c0_0] : memref<8x256xf32, #tpu.memory_space<vmem>>, vector<8x256xf32>
    %1 = math.exp %0 : vector<8x256xf32>
    %c0_1 = arith.constant 0 : index
    %c0_2 = arith.constant 0 : index
    %2 = vector.load %arg4[%c0_1, %c0_2] : memref<8x256xf32, #tpu.memory_space<vmem>>, vector<8x256xf32>
    tpu.vector_store %arg4[%c0_1, %c0_2], %1 {strides = array<i32>} : memref<8x256xf32, #tpu.memory_space<vmem>>, vector<8x256xf32>,
    %c0_3 = arith.constant 0 : index
    %c0_4 = arith.constant 0 : index
    %3 = vector.load %arg2[%c0_3, %c0_4] : memref<256x256xf32, #tpu.memory_space<vmem>>, vector<256x256xf32>
    %cst = arith.constant dense<0.000000e+00> : vector<8x256xf32>
    %4 = tpu.matmul %1, %3, %cst {dimension_numbers = #tpu.dot_dimension_numbers<[1], [0], [0], [1], [0, 0, 1, 1], [], []>} : vector<8x256xf32>, vector<256x256xf32>, vector<8x256xf32> -> vector<8x256xf32>
    %c0_5 = arith.constant 0 : index
    %c0_6 = arith.constant 0 : index
    %5 = vector.load %arg3[%c0_5, %c0_6] : memref<1x256xf32, #tpu.memory_space<vmem>>, vector<1x256xf32>
    %6 = vector.broadcast %5 : vector<1x256xf32> to vector<8x256xf32>
    %7 = arith.addf %4, %6 : vector<8x256xf32>
    %c0_7 = arith.constant 0 : index
    %c0_8 = arith.constant 0 : index
    %8 = vector.load %arg5[%c0_7, %c0_8] : memref<8x256xf32, #tpu.memory_space<vmem>>, vector<8x256xf32>
    tpu.vector_store %arg5[%c0_7, %c0_8], %7 {strides = array<i32>} : memref<8x256xf32, #tpu.memory_space<vmem>>, vector<8x256xf32>,
    return
  }
  func.func @transform_0(%arg0: i32) -> (i32, i32) {
    %c0_i32 = arith.constant 0 : i32
    %c0_i32_0 = arith.constant 0 : i32
    return %arg0, %c0_i32 : i32, i32
  }
  func.func @transform_1(%arg0: i32) -> (i32, i32) {
    %c0_i32 = arith.constant 0 : i32
    %c0_i32_0 = arith.constant 0 : i32
    %c0_i32_1 = arith.constant 0 : i32
    return %c0_i32, %c0_i32_0 : i32, i32
  }
  func.func @transform_2(%arg0: i32) -> (i32, i32) {
    %c0_i32 = arith.constant 0 : i32
    %c0_i32_0 = arith.constant 0 : i32
    %c0_i32_1 = arith.constant 0 : i32
    return %c0_i32, %c0_i32_0 : i32, i32
  }
  func.func @transform_3(%arg0: i32) -> (i32, i32) {
    %c0_i32 = arith.constant 0 : i32
    %c0_i32_0 = arith.constant 0 : i32
    return %arg0, %c0_i32 : i32, i32
  }
  func.func @transform_4(%arg0: i32) -> (i32, i32) {
    %c0_i32 = arith.constant 0 : i32
    %c0_i32_0 = arith.constant 0 : i32
    return %arg0, %c0_i32 : i32, i32
  }
}

</mosaic_0001>

<bundles_post_ra>
// kernel: tpu_custom_call.1
= control target key start
LH: loop header
LB: loop body
LE: loop exit
PB: predicated region body
PF: predicated region fallthrough
CT: control target
= control target key end

     0   :  { %10 = vsyncpa [#allocation3], 0  ;;  %s1005_s0 = inlined_call_operand.hbm [shape: f32[16,256], index: 0, kind: input, shape index: {}]   ;;  %s1006_s1 = inlined_call_operand.hbm [shape: f32[256,256], index: 1, kind: input, shape index: {}]   ;;  %s1007_s2 = inlined_call_operand.vmem [shape: f32[1,256], index: 2, kind: input, shape index: {}]   ;;  %s1008_s3 = inlined_call_operand.hbm [shape: f32[16,256], index: 3, kind: output, shape index: {0}]   ;;  %s1009_s4 = inlined_call_operand.hbm [shape: f32[16,256], index: 4, kind: output, shape index: {1}]  }
   0x1   :  { %12 = vsyncpa [#allocation3 + $0x1], 0 }
   0x2   :  { %13 = vsyncpa [#allocation6], 0 }
   0x3   :  { %14 = vsyncpa [#allocation4], 0 }
   0x4   :  { %16 = vsyncpa [#allocation4 + $0x1], 0 }
   0x5   :  { %17 = vsyncpa [#allocation9], 0 }
   0x6   :  { %19 = vsyncpa [#allocation9 + $0x1], 0  ;;  %s819_s15 = smov 0   ;;  %s821_s16 = smov 0  }
   0x7   :  { %s823_s17 = smov 0   ;;  %s825_s18 = smov 0  }
   0x8 LB: > { %s840_s19 = sadd.s32 4294967295, %s786_s18   ;;  %s543_s20 = sadd.s32 4294967294, %s786_s18   ;;  %s786_s18 = sphi %s825_s18, %s1031_s18   ;;  %s782_s17 = sphi %s823_s17, %s1030_s17   ;;  %s778_s16 = sphi %s821_s16, %s1029_s16   ;;  %s774_s15 = sphi %s819_s15, %s1028_s15  }
   0x9   : > { %p45_p0 = scmp.ne.s32.totalorder %s778_s16, %s774_s15  ;;  %p1010_p1 = scmp.eq.s32.totalorder %s840_s19, 0 }
   0xa   : > { %p117_p3 = scmp.eq.s32.totalorder %s543_s20, 1  ;;  %p544_p5 = scmp.ge.s32.totalorder %s786_s18, 1 }
   0xb   : > { %p849_p4 = por %p1010_p1, %p45_p0  ;;  %p150_p7 = scmp.lt.s32.totalorder %s786_s18, 3 }
   0xc   : > { %p854_p6 = por %p117_p3, %p45_p0  ;;  %s788_s24 = smov [#allocation5]  }
   0xd   : > { %s1014_s21 = scalar_select %p849_p4, 1, 0 }
   0xe   : > { %s1015_s22 = scalar_select %p854_p6, 1, 0 }
   0xf   : > { %p859_p8 = pnand %p544_p5, %p150_p7  ;;  %s162_s25 = sshll.u32 %s788_s24, 4  ;;  %s163_s25 = int_to_ptr.vmem [resolvable:$true] %s162_s25 }
  0x10   : > { %s873_s27 = sadd.s32 1, %s786_s18   ;;  %s32_s28 = sadd.s32 1, %s782_s17 }
  0x11   : > { %s1016_s23 = scalar_select %p859_p8, 1, 0 }
  0x12   : > { %p576_p9 = pneg %p859_p8  ;;  %s29_s29 = ssub.s32 %s786_s18, %s873_s27 }
  0x13   : > { %s645_s30 = scalar_lea.vmem %s163_s25, 8192  ;;  %p653_p5 = scmp.lt.s32.totalorder %s163_s25, %s163_s25 }
  0x14   : > { %p868_p11 = pnand %p576_p9, %p1010_p1  ;;  %p646_p13 = scmp.ne.s32.totalorder %s163_s25, %s645_s30 }
  0x15   : > { %p654_p7 = scmp.lt.s32.totalorder %s645_s30, %s645_s30 }
  0x16   : > { %p636_p12 = pneg %p868_p11 }
  0x17   : > { %p655_p10 = por %p654_p7, %p653_p5 }
  0x18   : > { %p648_p0 = pnand %p646_p13, %p636_p12 }
  0x1a   : > { %p649_p3 = pneg %p648_p0 }
  0x1c   : > { %p656_p2 = pnand %p655_p10, %p649_p3 }
  0x1e   : > { %659 = shalt.err (!%p656_p2)
}
  0x1f   : > { %s789_s5 = smov 256   ;;  %s790_s6 = smov 16  }
  0x20   : > { %579 = dma.hbm_to_vmem [thread:$0]  (!%p868_p11), %s1006_s1, 8192, %s163_s25, [#allocation6], %s789_s5, %s789_s5, %s790_s6  }
  0x21   : > { %p30_p9 = scmp.eq.s32.totalorder %s29_s29, 0  ;;  %p39_p12 = scmp.ne.s32.totalorder %s782_s17, %s778_s16 }
  0x22   : > { %p40_p10 = scmp.eq.s32.totalorder %s786_s18, 0  ;;  %p592_p2 = scmp.lt.s32.totalorder %s786_s18, 2 }
  0x23   : > { %s890_s9 = scalar_select %p30_p9, %s782_s17, %s32_s28  }
  0x24   : > { %p41_p13 = por %p40_p10, %p39_p12  ;;  %p1018_p0 = scmp.eq.s32.totalorder %s840_s19, 1 }
  0x25   : > { %s179_s11 = sand.u32 1, %s782_s17   ;;  %s563_s12 = sshll.u32 %s786_s18, 8 }
  0x26   : > { %p894_p3 = por %p1018_p0, %p39_p12  ;;  %s547_s13 = sshll.u32 %s179_s11, 4 }
  0x27   : > { %s903_s24 = scalar_lea.hbm %s1005_s0, %s563_s12  ;;  %s183_s25 = scalar_lea.vmem [#allocation2], %s547_s13 }
  0x28   : > { %s1019_s10 = scalar_select %p894_p3, 1, 0 }
  0x29   : > { %s191_s26 = sshll.u32 %s183_s25, 4  ;;  %p905_p11 = pnand %p592_p2, %p41_p13  ;;  %s192_s26 = int_to_ptr.vmem [resolvable:$true] %s191_s26 }
  0x2a   : > { %s180_s29 = scalar_lea.sflag [#allocation3], %s179_s11  ;;  %s660_s30 = scalar_lea.hbm %s903_s24, 256 }
  0x2b   : > { %p661_p5 = scmp.ne.s32.totalorder %s903_s24, %s660_s30  ;;  %p662_p7 = pneg %p905_p11 }
  0x2c   : > { %s665_s7 = scalar_lea.hbm %s1005_s0, 512  ;;  %p666_p10 = scmp.lt.s32.totalorder %s903_s24, %s1005_s0 }
  0x2d   : > { %p663_p9 = pnand %p662_p7, %p661_p5  ;;  %p667_p2 = scmp.lt.s32.totalorder %s665_s7, %s660_s30 }
  0x2f   : > { %p664_p12 = pneg %p663_p9  ;;  %p668_p13 = por %p667_p2, %p666_p10 }
  0x31   : > { %p669_p0 = pnand %p668_p13, %p664_p12 }
  0x33   : > { %672 = shalt.err (!%p669_p0)
}
  0x34   : > { %s673_s13 = scalar_lea.vmem %s192_s26, 256  ;;  %s791_s11 = smov [#allocation2]  }
  0x35   : > { %p674_p1 = scmp.ne.s32.totalorder %s192_s26, %s673_s13  ;;  %s678_s14 = sshll.u32 %s791_s11, 4  ;;  %s679_s14 = int_to_ptr.vmem [resolvable:$false] %s678_s14 }
  0x36   : > { %s680_s20 = scalar_lea.vmem %s679_s14, 512  ;;  %p681_p5 = scmp.lt.s32.totalorder %s192_s26, %s679_s14 }
  0x37   : > { %p676_p6 = pnand %p674_p1, %p662_p7  ;;  %p682_p9 = scmp.lt.s32.totalorder %s680_s20, %s673_s13 }
  0x39   : > { %p677_p3 = pneg %p676_p6  ;;  %p683_p4 = por %p682_p9, %p681_p5 }
  0x3b   : > { %p684_p8 = pnand %p683_p4, %p677_p3 }
  0x3d   : > { %687 = shalt.err (!%p684_p8)
}
  0x3e   : > { %583 = dma.hbm_to_vmem [thread:$0]  (!%p905_p11), %s903_s24, 256, %s192_s26, %s180_s29  }
  0x3f   : > { %p1021_p12 = scmp.ne.s32.totalorder %s1016_s23, 0 }
  0x40   : > { %s926_s25 = sand.u32 (!%p1021_p12), 1, %s778_s16   ;;  %p1022_p1 = scmp.ne.s32.totalorder (!%p1021_p12), %s1014_s21, 0 }
  0x41   : > { %200 = sbr.rel (%p1021_p12) target bundleno = 349 (0x15d), region = 32  ;;  %s929_s30 = sshll.u32 (!%p1021_p12), %s926_s25, 4 }
  0x42   : > { %s203_s5 = scalar_lea.sflag (!%p1021_p12), [#allocation3], %s926_s25  ;;  %s206_s6 = scalar_lea.vmem (!%p1021_p12), [#allocation2], %s929_s30 }
  0x46   : > { %757 = dma.done.wait (%p1022_p1), %s203_s5, 256  }
  0x47   : > { %759 = vsyncadd (%p1022_p1), %s203_s5, 4294967040  ;;  %p1023_p4 = scmp.eq.s32.totalorder %s840_s19, 0 }
  0x49   : > { %761 = dma.done.wait (%p1023_p4), [#allocation6], 8192   ;;  %p1024_p6 = pmov %p1023_p4 }
  0x4a   : > { %v279_v0 = vld [vmem:[#allocation5 + $0xf8] sm:$0xff]  ;;  %v278_v1 = vld [vmem:[#allocation5 + $0xf0] sm:$0xff]  ;;  %v277_v2 = vld [vmem:[#allocation5 + $0xe8] sm:$0xff]  ;;  %s232_s21 = scalar_lea.vmem [#allocation7], %s929_s30  ;;  %s564_s23 = sshll.u32 %s840_s19, 8 }
  0x4b   : > { %763 = vsyncadd (%p1024_p6), [#allocation6], 4294959104  ;;  %324 = vmatprep.subr.mxu0 %v279_v0  ;;  %v276_v3 = vld [vmem:[#allocation5 + $0xe0] sm:$0xff]  ;;  %v275_v4 = vld [vmem:[#allocation5 + $0xd8] sm:$0xff]  ;;  %s417_s24 = sshll.u32 %s232_s21, 4  ;;  %s415_s29 = scalar_lea.hbm %s1008_s3, %s564_s23  ;;  %s418_s24 = int_to_ptr.vmem [resolvable:$true] %s417_s24 }
  0x4c   : > { %325 = vmatpush1.msra.mxu0 %v278_v1  ;;  %v274_v5 = vld [vmem:[#allocation5 + $0xd0] sm:$0xff]  ;;  %v273_v6 = vld [vmem:[#allocation5 + $0xc8] sm:$0xff]  ;;  %v272_v7 = vld [vmem:[#allocation5 + $0xc0] sm:$0xff]  ;;  %s398_s7 = scalar_lea.sflag [#allocation4], %s926_s25  ;;  %s688_s8 = scalar_lea.vmem %s418_s24, 256 }
  0x4d   : > { %326 = vmatprep.subr.mxu0 %v277_v2  ;;  %v271_v8 = vld [vmem:[#allocation5 + $0xb8] sm:$0xff]  ;;  %v270_v9 = vld [vmem:[#allocation5 + $0xb0] sm:$0xff]  ;;  %v269_v10 = vld [vmem:[#allocation5 + $0xa8] sm:$0xff]  ;;  %p689_p8 = scmp.ne.s32.totalorder %s418_s24, %s688_s8  ;;  %p1025_p3 = scmp.ne.s32.totalorder %s1019_s10, 0 }
  0x4e   : > { %327 = vmatpush1.msra.mxu0 %v276_v3  ;;  %v268_v11 = vld [vmem:[#allocation5 + $0xa0] sm:$0xff]  ;;  %v267_v12 = vld [vmem:[#allocation5 + $0x98] sm:$0xff]  ;;  %v266_v13 = vld [vmem:[#allocation5 + $0x90] sm:$0xff]  ;;  %s792_s12 = smov [#allocation7]  }
  0x4f   : > { %328 = vmatprep.subr.mxu0 %v275_v4  ;;  %v265_v14 = vld [vmem:[#allocation5 + $0x88] sm:$0xff]  ;;  %v264_v15 = vld [vmem:[#allocation5 + $0x80] sm:$0xff]  ;;  %v263_v16 = vld [vmem:[#allocation5 + $0x78] sm:$0xff]  ;;  %p690_p11 = pnand %p689_p8, %p1025_p3  ;;  %s692_s13 = sshll.u32 %s792_s12, 4  ;;  %s693_s13 = int_to_ptr.vmem [resolvable:$false] %s692_s13 }
  0x50   : > { %329 = vmatpush1.msra.mxu0 %v274_v5  ;;  %v262_v17 = vld [vmem:[#allocation5 + $0x70] sm:$0xff]  ;;  %v261_v18 = vld [vmem:[#allocation5 + $0x68] sm:$0xff]  ;;  %v260_v19 = vld [vmem:[#allocation5 + $0x60] sm:$0xff]  ;;  %s694_s11 = scalar_lea.vmem %s693_s13, 512  ;;  %p695_p10 = scmp.lt.s32.totalorder %s418_s24, %s693_s13 }
  0x51   : > { %330 = vmatprep.subr.mxu0 %v273_v6  ;;  %v259_v20 = vld [vmem:[#allocation5 + $0x58] sm:$0xff]  ;;  %v258_v21 = vld [vmem:[#allocation5 + $0x50] sm:$0xff]  ;;  %v257_v22 = vld [vmem:[#allocation5 + $0x48] sm:$0xff]  ;;  %p691_p7 = pneg %p690_p11  ;;  %p696_p2 = scmp.lt.s32.totalorder %s694_s11, %s688_s8 }
  0x52   : > { %331 = vmatpush1.msra.mxu0 %v272_v7  ;;  %v256_v23 = vld [vmem:[#allocation5 + $0x40] sm:$0xff]  ;;  %v241_v24 = vld [vmem:[%s206_s6 + $0x8] sm:$0xff]  ;;  %v254_v27 = vld [vmem:[#allocation5 + $0x30] sm:$0xff] }
  0x53   : > { %332 = vmatprep.subr.mxu0 %v271_v8  ;;  %v255_v25 = vld [vmem:[#allocation5 + $0x38] sm:$0xff]  ;;  %v244_v26 = vmul.f32 1.442695, %v241_v24  ;;  %v253_v28 = vld [vmem:[#allocation5 + $0x28] sm:$0xff]  ;;  %v252_v29 = vld [vmem:[#allocation5 + $0x20] sm:$0xff]  ;;  %p697_p13 = por %p696_p2, %p695_p10 }
  0x54   : > { %333 = vmatpush1.msra.mxu0 %v270_v9  ;;  %v251_v30 = vld [vmem:[#allocation5 + $0x18] sm:$0xff]  ;;  %v250_v31 = vld [vmem:[#allocation5 + $0x10] sm:$0xff]  ;;  %v249_v32 = vld [vmem:[#allocation5 + $0x8] sm:$0xff] }
  0x55   : > { %334 = vmatprep.subr.mxu0 %v269_v10  ;;  %630 = vpow2.f32 %v244_v26  ;;  %v248_v33 = vld [vmem:[#allocation5] sm:$0xff]  ;;  %v311_v34 = vld [vmem:[#allocation5 + $0x1f8] sm:$0xff]  ;;  %v310_v35 = vld [vmem:[#allocation5 + $0x1f0] sm:$0xff]  ;;  %p698_p0 = pnand %p697_p13, %p691_p7 }
  0x56   : > { %335 = vmatpush1.msra.mxu0 %v268_v11  ;;  %v309_v36 = vld [vmem:[#allocation5 + $0x1e8] sm:$0xff]  ;;  %v308_v37 = vld [vmem:[#allocation5 + $0x1e0] sm:$0xff]  ;;  %v307_v38 = vld [vmem:[#allocation5 + $0x1d8] sm:$0xff] }
  0x57   : > { %336 = vmatprep.subr.mxu0 %v267_v12  ;;  %v306_v39 = vld [vmem:[#allocation5 + $0x1d0] sm:$0xff]  ;;  %v305_v40 = vld [vmem:[#allocation5 + $0x1c8] sm:$0xff]  ;;  %v304_v42 = vld [vmem:[#allocation5 + $0x1c0] sm:$0xff] }
  0x58   : > { %337 = vmatpush1.msra.mxu0 %v266_v13  ;;  %v303_v43 = vld [vmem:[#allocation5 + $0x1b8] sm:$0xff]  ;;  %v302_v44 = vld [vmem:[#allocation5 + $0x1b0] sm:$0xff]  ;;  %v301_v45 = vld [vmem:[#allocation5 + $0x1a8] sm:$0xff] }
  0x59   : > { %338 = vmatprep.subr.mxu0 %v265_v14  ;;  %v300_v46 = vld [vmem:[#allocation5 + $0x1a0] sm:$0xff]  ;;  %v299_v47 = vld [vmem:[#allocation5 + $0x198] sm:$0xff]  ;;  %v298_v49 = vld [vmem:[#allocation5 + $0x190] sm:$0xff] }
  0x5a   : > { %339 = vmatpush1.msra.mxu0 %v264_v15  ;;  %v240_v48 = vld [vmem:[%s206_s6] sm:$0xff]  ;;  %v297_v50 = vld [vmem:[#allocation5 + $0x188] sm:$0xff]  ;;  %v295_v53 = vld [vmem:[#allocation5 + $0x178] sm:$0xff] }
  0x5b   : > { %340 = vmatprep.subr.mxu0 %v263_v16  ;;  %v296_v51 = vld [vmem:[#allocation5 + $0x180] sm:$0xff]  ;;  %v242_v52 = vmul.f32 1.442695, %v240_v48  ;;  %v294_v54 = vld [vmem:[#allocation5 + $0x170] sm:$0xff]  ;;  %v293_v55 = vld [vmem:[#allocation5 + $0x168] sm:$0xff] }
  0x5c   : > { %341 = vmatpush1.msra.mxu0 %v262_v17  ;;  %v292_v56 = vld [vmem:[#allocation5 + $0x160] sm:$0xff]  ;;  %v291_v57 = vld [vmem:[#allocation5 + $0x158] sm:$0xff]  ;;  %v290_v58 = vld [vmem:[#allocation5 + $0x150] sm:$0xff] }
  0x5d   : > { %342 = vmatprep.subr.mxu0 %v261_v18  ;;  %632 = vpow2.f32 %v242_v52  ;;  %v289_v59 = vld [vmem:[#allocation5 + $0x148] sm:$0xff]  ;;  %v288_v60 = vld [vmem:[#allocation5 + $0x140] sm:$0xff]  ;;  %v287_v61 = vld [vmem:[#allocation5 + $0x138] sm:$0xff] }
  0x5e   : > { %343 = vmatpush1.msra.mxu0 %v260_v19  ;;  %v286_v62 = vld [vmem:[#allocation5 + $0x130] sm:$0xff]  ;;  %v285_v63 = vld [vmem:[#allocation5 + $0x128] sm:$0xff]  ;;  %v284_v0 = vld [vmem:[#allocation5 + $0x120] sm:$0xff] }
  0x5f   : > { %344 = vmatprep.subr.mxu0 %v259_v20  ;;  %v283_v1 = vld [vmem:[#allocation5 + $0x118] sm:$0xff]  ;;  %v282_v2 = vld [vmem:[#allocation5 + $0x110] sm:$0xff]  ;;  %v281_v3 = vld [vmem:[#allocation5 + $0x108] sm:$0xff] }
  0x60   : > { %345 = vmatpush1.msra.mxu0 %v258_v21  ;;  %v280_v4 = vld [vmem:[#allocation5 + $0x100] sm:$0xff] }
  0x61   : > { %346 = vmatprep.subr.mxu0 %v257_v22 }
  0x62   : > { %347 = vmatpush1.msra.mxu0 %v256_v23  ;;  %v631_v41 = vpop.eup %630 }
  0x63   : > { %348 = vmatprep.subr.mxu0 %v255_v25  ;;  %388 = vmatprep.mubr.f32.mxu0 %v631_v41  ;;  %247 = vst [vmem:[%s232_s21 + $0x8] sm:$0xff] %v631_v41 }
  0x64   : > { %349 = vmatpush1.msra.mxu0 %v254_v27 }
  0x65   : > { %350 = vmatprep.subr.mxu0 %v253_v28 }
  0x66   : > { %351 = vmatpush1.msra.mxu0 %v252_v29 }
  0x67   : > { %352 = vmatprep.subr.mxu0 %v251_v30 }
  0x68   : > { %353 = vmatpush1.msra.mxu0 %v250_v31 }
  0x69   : > { %354 = vmatprep.subr.mxu0 %v249_v32 }
  0x6a   : > { %355 = vmatpush1.msra.mxu0 %v248_v33  ;;  %v633_v5 = vpop.eup %632 }
  0x6b   : > { %356 = vmatprep.subr.mxu0 %v311_v34  ;;  %246 = vst [vmem:[%s232_s21] sm:$0xff] %v633_v5 }
  0x6c   : > { %357 = vmatpush2.msra.mxu0 %v310_v35 }
  0x6d   : > { %358 = vmatprep.subr.mxu0 %v309_v36 }
  0x6e   : > { %359 = vmatpush2.msra.mxu0 %v308_v37 }
  0x6f   : > { %360 = vmatprep.subr.mxu0 %v307_v38 }
  0x70   : > { %361 = vmatpush2.msra.mxu0 %v306_v39 }
  0x71   : > { %362 = vmatprep.subr.mxu0 %v305_v40 }
  0x72   : > { %363 = vmatpush2.msra.mxu0 %v304_v42 }
  0x73   : > { %364 = vmatprep.subr.mxu0 %v303_v43 }
  0x74   : > { %365 = vmatpush2.msra.mxu0 %v302_v44 }
  0x75   : > { %366 = vmatprep.subr.mxu0 %v301_v45 }
  0x76   : > { %367 = vmatpush2.msra.mxu0 %v300_v46 }
  0x77   : > { %368 = vmatprep.subr.mxu0 %v299_v47 }
  0x78   : > { %369 = vmatpush2.msra.mxu0 %v298_v49 }
  0x79   : > { %370 = vmatprep.subr.mxu0 %v297_v50 }
  0x7a   : > { %371 = vmatpush2.msra.mxu0 %v296_v51 }
  0x7b   : > { %372 = vmatprep.subr.mxu0 %v295_v53 }
  0x7c   : > { %373 = vmatpush2.msra.mxu0 %v294_v54 }
  0x7d   : > { %374 = vmatprep.subr.mxu0 %v293_v55 }
  0x7e   : > { %375 = vmatpush2.msra.mxu0 %v292_v56 }
  0x7f   : > { %376 = vmatprep.subr.mxu0 %v291_v57 }
  0x80   : > { %377 = vmatpush2.msra.mxu0 %v290_v58 }
  0x81   : > { %378 = vmatprep.subr.mxu0 %v289_v59 }
  0x82   : > { %379 = vmatpush2.msra.mxu0 %v288_v60 }
  0x83   : > { %380 = vmatprep.subr.mxu0 %v287_v61 }
  0x84   : > { %381 = vmatpush2.msra.mxu0 %v286_v62 }
  0x85   : > { %382 = vmatprep.subr.mxu0 %v285_v63 }
  0x86   : > { %383 = vmatpush2.msra.mxu0 %v284_v0 }
  0x87   : > { %384 = vmatprep.subr.mxu0 %v283_v1 }
  0x88   : > { %385 = vmatpush2.msra.mxu0 %v282_v2 }
  0x89   : > { %386 = vmatprep.subr.mxu0 %v281_v3 }
  0x8a   : > { %387 = vmatpush2.msra.mxu0 %v280_v4 }
  0x8b   : > { %389 = vmatmul.mubr.f32.vlgmr.msra.gmra.mxu0 %v633_v5 }
  0x8c   : > { %701 = shalt.err (!%p698_p0)
}
  0x8d   : > { %s702_s14 = scalar_lea.hbm %s415_s29, 256  ;;  %s706_s6 = scalar_lea.hbm %s1008_s3, 512 }
  0x8e   : > { %p703_p5 = scmp.ne.s32.totalorder %s415_s29, %s702_s14  ;;  %p707_p1 = scmp.lt.s32.totalorder %s415_s29, %s1008_s3 }
  0x8f   : > { %p708_p4 = scmp.lt.s32.totalorder %s706_s6, %s702_s14 }
  0x90   : > { %p704_p9 = pnand %p703_p5, %p1025_p3 }
  0x91   : > { %p709_p6 = por %p708_p4, %p707_p1 }
  0x92   : > { %p705_p12 = pneg %p704_p9 }
  0x94   : > { %p710_p8 = pnand %p709_p6, %p705_p12 }
  0x96   : > { %713 = shalt.err (!%p710_p8)
}
  0x97   : > { %572 = dma.vmem_to_hbm [thread:$0]  (%p1025_p3), %s418_s24, 256, %s415_s29, %s398_s7   ;;  %v314_v6 = vlaneseq  ;;  %v312_v9 = vld [vmem:[%s1007_s2] sm:$0x3] }
  0x98   : > { %s239_s12 = scalar_lea.vmem [#allocation8], %s929_s30  ;;  %s429_s7 = scalar_lea.hbm %s1009_s4, %s564_s23 }
  0x99   : > { %v315_v7 = vshrl.u32 %v314_v6, 7  ;;  %s431_s13 = sshll.u32 %s239_s12, 4  ;;  %s403_s11 = scalar_lea.sflag [#allocation9], %s926_s25  ;;  %s432_s13 = int_to_ptr.vmem [resolvable:$true] %s431_s13 }
  0x9a   : > { %s714_s14 = scalar_lea.vmem %s432_s13, 256  ;;  %s793_s20 = smov [#allocation8]  }
  0x9b   : > { %v316_v8 = vsub.s32 0, %v315_v7  ;;  %v320_v10 = vsub.s32 1, %v315_v7  ;;  %p715_p11 = scmp.ne.s32.totalorder %s432_s13, %s714_s14  ;;  %s718_s30 = sshll.u32 %s793_s20, 4  ;;  %s719_s30 = int_to_ptr.vmem [resolvable:$false] %s718_s30 }
  0x9c   : > { %s720_s5 = scalar_lea.vmem %s719_s30, 512  ;;  %p721_p2 = scmp.lt.s32.totalorder %s432_s13, %s719_s30 }
  0x9d   : > { %v317_v11 = vrot.slane %v312_v9, %v316_v8  ;;  %v321_v12 = vrot.slane %v312_v9, %v320_v10  ;;  %p716_p7 = pnand %p715_p11, %p1025_p3  ;;  %p722_p13 = scmp.lt.s32.totalorder %s720_s5, %s714_s14 }
  0x9f   : > { %p717_p10 = pneg %p716_p7  ;;  %p723_p0 = por %p722_p13, %p721_p2 }
  0xa1   : > { %p724_p5 = pnand %p723_p0, %p717_p10 }
 0x14b   : > { %v390_v13 = vpop.f32.mrf.mxu0 }
 0x14c   : > { %v391_v14 = vadd.f32 %v390_v13, %v317_v11 }
 0x14d   : > { %v392_v15 = vpop.f32.mrf.mxu0 }
 0x14e   : > { %395 = vst [vmem:[%s239_s12] sm:$0xff] %v391_v14  ;;  %v393_v16 = vadd.f32 %v392_v15, %v321_v12 }
 0x150   : > { %396 = vst [vmem:[%s239_s12 + $0x8] sm:$0xff] %v393_v16 }
 0x151   : > { %727 = shalt.err (!%p724_p5)
}
 0x152   : > { %s728_s19 = scalar_lea.hbm %s429_s7, 256  ;;  %s732_s6 = scalar_lea.hbm %s1009_s4, 512 }
 0x153   : > { %p729_p9 = scmp.ne.s32.totalorder %s429_s7, %s728_s19  ;;  %p733_p4 = scmp.lt.s32.totalorder %s429_s7, %s1009_s4 }
 0x154   : > { %p734_p6 = scmp.lt.s32.totalorder %s732_s6, %s728_s19 }
 0x155   : > { %p730_p12 = pnand %p729_p9, %p1025_p3 }
 0x156   : > { %p735_p8 = por %p734_p6, %p733_p4 }
 0x157   : > { %p731_p1 = pneg %p730_p12 }
 0x159   : > { %p736_p11 = pnand %p735_p8, %p731_p1 }
 0x15b   : > { %739 = shalt.err (!%p736_p11)
}
 0x15c   : > { %573 = dma.vmem_to_hbm [thread:$0]  (%p1025_p3), %s432_s13, 256, %s429_s7, %s403_s11  }
 0x15d PF: > { %s443_s28 = sand.u32 1, %s774_s15   ;;  %p1026_p7 = scmp.ne.s32.totalorder %s1015_s22, 0 }
 0x15e   : > { %p1027_p10 = scmp.ge.s32.totalorder %s786_s18, 2  ;;  %s444_s8 = scalar_lea.sflag [#allocation4], %s443_s28 }
 0x160   : > { %p585_p2 = pnand %p1027_p10, %p1026_p7 }
 0x162   : > { %p586_p13 = pneg %p585_p2 }
 0x164   : > { %765 = dma.done.wait (%p586_p13), %s444_s8, 256  }
 0x165   : > { %767 = vsyncadd (%p586_p13), %s444_s8, 4294967040  ;;  %s453_s12 = scalar_lea.sflag [#allocation9], %s443_s28 }
 0x166   : > { %769 = dma.done.wait (%p586_p13), %s453_s12, 256  }
 0x167   : > { %771 = vsyncadd (%p586_p13), %s453_s12, 4294967040  ;;  %p22_p3 = scmp.ge.s32.totalorder %s873_s27, 4   ;;  %s1028_s15 = smov %s778_s16 }
 0x168   : > { %s1029_s16 = smov %s782_s17  ;;  %s1030_s17 = smov %s890_s9 }
 0x169   : > { %s1031_s18 = smov %s873_s27  ;;  %24 = sbr.rel (!%p22_p3) target bundleno = 8 (0x8), region = 98 }
 0x16e   :  { %458 = vsyncpa [#allocation3], 1 }
 0x16f   :  { %460 = vsyncpa [#allocation3 + $0x1], 1 }
 0x170   :  { %461 = vsyncpa [#allocation6], 1 }
 0x171   :  { %462 = vsyncpa [#allocation4], 1 }
 0x172   :  { %464 = vsyncpa [#allocation4 + $0x1], 1 }
 0x173   :  { %465 = vsyncpa [#allocation9], 1 }
 0x174   :  { %467 = vsyncpa [#allocation9 + $0x1], 1 }

</bundles_post_ra>
